<compile_context>
chip_gen: v6e
topology: v6e:2x2x1
jax: 0.10.0
libtpu: 0.0.40
codegen_flags: <defaults>
</compile_context>

<pallas_src>
import jax
import jax.numpy as jnp
from jax.experimental import pallas as pl
from jax.experimental.pallas import tpu as pltpu


def linear_kernel(x_ref, wb_ref, o_ref):
    # x: (B, F_in); wb: (F_in + 1, F_out) = [W^T ; b] packed at setup time.
    x = x_ref[...]
    wb = wb_ref[...]
    f_in = x.shape[1]

    w = wb[:f_in, :]      # (F_in, F_out)  -- static slice, zero runtime cost
    b = wb[f_in:, :]      # (1, F_out)

    # MXU matmul with f32 accumulation + VPU bias add.
    y = jnp.dot(x, w, preferred_element_type=jnp.float32) + b
    o_ref[...] = y.astype(o_ref.dtype)


def prepare_params(weight, bias):
    """One-time parameter prep (hoisted out of the per-call hot path).

    weight: (F_out, F_in) in PyTorch convention; bias: (F_out,).
    Returns a single packed (F_in + 1, F_out) array: rows [0:F_in] are W^T,
    row [F_in] is the bias.
    """
    return jnp.concatenate([weight.T, bias.reshape(1, -1)], axis=0)


def linear_pallas(x, wb):
    """x: (B, F_in); wb: (F_in + 1, F_out) packed [W^T ; b]. Returns (B, F_out)."""
    B, F_in = x.shape
    F_out = wb.shape[1]
    out_dtype = x.dtype

    bytes_acc = (
        x.size * x.dtype.itemsize
        + wb.size * wb.dtype.itemsize
        + B * F_out * jnp.dtype(out_dtype).itemsize
    )

    return pl.pallas_call(
        linear_kernel,
        out_shape=jax.ShapeDtypeStruct((B, F_out), out_dtype),
        in_specs=[
            pl.BlockSpec(memory_space=pltpu.MemorySpace.VMEM),
            pl.BlockSpec(memory_space=pltpu.MemorySpace.VMEM),
        ],
        out_specs=pl.BlockSpec(memory_space=pltpu.MemorySpace.VMEM),
        cost_estimate=pl.CostEstimate(
            flops=2 * B * F_in * F_out,
            transcendentals=0,
            bytes_accessed=bytes_acc,
        ),
    )(x, wb)


if __name__ == "__main__":
    key = jax.random.PRNGKey(0)
    kx, kw, kb = jax.random.split(key, 3)

    B, F_in, F_out = 8, 3, 3
    x = jax.random.normal(kx, (B, F_in), dtype=jnp.float32)

    # PyTorch-style uniform init with bound 1/sqrt(fan_in).
    bound = 1.0 / (F_in ** 0.5)
    weight = jax.random.uniform(kw, (F_out, F_in), jnp.float32, -bound, bound)
    bias = jax.random.uniform(kb, (F_out,), jnp.float32, -bound, bound)

    # One-time setup (not in the per-call hot path).
    wb = prepare_params(weight, bias)

    y = linear_pallas(x, wb)
    jax.block_until_ready(y)

    # Correctness check against plain JAX reference of the same math.
    y_ref = x @ weight.T + bias
    assert jnp.allclose(y, y_ref, atol=1e-5, rtol=1e-5), "mismatch vs reference"

    print("KERNEL_OK")
</pallas_src>

<mosaic_0001>
module attributes {stable_mosaic.version = 11 : i64} {
  func.func @linear_kernel(%arg0: memref<8x3xf32, #tpu.memory_space<vmem>>, %arg1: memref<4x3xf32, #tpu.memory_space<vmem>>, %arg2: memref<8x3xf32, #tpu.memory_space<vmem>>) attributes {dimension_semantics = [], scalar_prefetch = 0 : i64, scratch_operands = 0 : i64, tpu.core_type = #tpu.core_type<tc>} {
    %c0 = arith.constant 0 : index
    %c0_0 = arith.constant 0 : index
    %0 = vector.load %arg0[%c0, %c0_0] : memref<8x3xf32, #tpu.memory_space<vmem>>, vector<8x3xf32>
    %c0_1 = arith.constant 0 : index
    %c0_2 = arith.constant 0 : index
    %1 = vector.load %arg1[%c0_1, %c0_2] : memref<4x3xf32, #tpu.memory_space<vmem>>, vector<4x3xf32>
    %2 = vector.extract_strided_slice %1 {offsets = [0, 0], sizes = [3, 3], strides = [1, 1]} : vector<4x3xf32> to vector<3x3xf32>
    %3 = vector.extract_strided_slice %1 {offsets = [3, 0], sizes = [1, 3], strides = [1, 1]} : vector<4x3xf32> to vector<1x3xf32>
    %cst = arith.constant dense<0.000000e+00> : vector<8x3xf32>
    %4 = tpu.matmul %0, %2, %cst {dimension_numbers = #tpu.dot_dimension_numbers<[1], [0], [0], [1], [0, 0, 1, 1], [], []>} : vector<8x3xf32>, vector<3x3xf32>, vector<8x3xf32> -> vector<8x3xf32>
    %5 = vector.broadcast %3 : vector<1x3xf32> to vector<8x3xf32>
    %6 = arith.addf %4, %5 : vector<8x3xf32>
    %c0_3 = arith.constant 0 : index
    %c0_4 = arith.constant 0 : index
    %7 = vector.load %arg2[%c0_3, %c0_4] : memref<8x3xf32, #tpu.memory_space<vmem>>, vector<8x3xf32>
    tpu.vector_store %arg2[%c0_3, %c0_4], %6 {strides = array<i32>} : memref<8x3xf32, #tpu.memory_space<vmem>>, vector<8x3xf32>,
    return
  }
}

</mosaic_0001>

<bundles_post_ra>
// kernel: tpu_custom_call.1
= control target key start
LH: loop header
LB: loop body
LE: loop exit
PB: predicated region body
PF: predicated region fallthrough
CT: control target
= control target key end

     0   :  { %vm21_vm0 = vcmask 1042432   ;;  %vm17_vm1 = vcmask 23552   ;;  %v111_v0 = vmov 0.0   ;;  %vm112_vm2 = vmmov 0   ;;  %s139_s1 = inlined_call_operand.vmem [shape: f32[4,3], index: 1, kind: input, shape index: {}]   ;;  %s140_s0 = inlined_call_operand.vmem [shape: f32[8,3], index: 0, kind: input, shape index: {}]   ;;  %s141_s2 = inlined_call_operand.vmem [shape: f32[8,3], index: 2, kind: output, shape index: {}]  }
   0x1   :  { %104 = vmatprep.subr.mxu0 %v111_v0  ;;  %v12_v1 = vld [vmem:[%s139_s1] sm:$0xf]  ;;  %106 = vmatprep.mubr.msk.f32.mxu0 %vm112_vm2, %v111_v0  ;;  %v13_v3 = vlaneseq }
   0x2   :  { %v11_v2 = vld [vmem:[%s140_s0] sm:$0xff]  ;;  %105 = vmatpush3.msk.msra.mxu0 %vm21_vm0, %v12_v1 }
   0x3   :  { %107 = vmatmul.mubr.msk.f32.vlgmr.msra.gmra.mxu0 %vm17_vm1, %v11_v2  ;;  %v14_v4 = vshrl.u32 %v13_v3, 7 }
   0x5   :  { %v15_v5 = vsub.s32 3, %v14_v4 }
   0x7   :  { %v16_v6 = vrot.slane %v12_v1, %v15_v5 }
  0xc3   :  { %v91_v7 = vpop.f32.mrf.mxu0 }
  0xc4   :  { %v92_v8 = vadd.f32 %v91_v7, %v16_v6 }
  0xc5   :  { %v108_v9 = vpop.f32.mrf.mxu0 }
  0xc6   :  { %95 = vst.msk [vmem:[%s141_s2] sm:$0xff] %vm17_vm1, %v92_v8 }

</bundles_post_ra>
